<compile_context>
chip_gen: v6e
topology: v6e:2x2x1
jax: 0.10.0
libtpu: 0.0.40
codegen_flags: <defaults>
</compile_context>

<pallas_src>
import functools

import jax
import jax.numpy as jnp
import numpy as np
from jax import lax
from jax.experimental import pallas as pl
from jax.experimental.pallas import tpu as pltpu


def _lstm_kernel(x_ref, wih_ref, whh_ref, b_ref, wlin_ref, blin_ref,
                 o_ref, xw_sc, *, seq_len, batch_padded, hidden_dim):
    """Whole sequence in one invocation; recurrence is an unrolled in-kernel loop."""
    S, Bp, H = seq_len, batch_padded, hidden_dim

    # (1) Hoisted input projection for ALL time steps: one (S*Bp, C)@(C, 4H)
    #     MXU push, with the combined bias broadcast folded in exactly once.
    xw_sc[...] = (jnp.dot(x_ref[...], wih_ref[...],
                          preferred_element_type=jnp.float32)
                  + b_ref[...])                       # (S*Bp, 4H)

    whh = whh_ref[...]                                # (H, 4H), loaded once

    def step(t, carry):
        h, c = carry
        # Per-step work on the serial critical path: one (Bp,H)@(H,4H) matmul
        # plus elementwise gate math.  Slice start is 8-sublane aligned.
        row0 = pl.multiple_of(t * Bp, 8)
        x_t = xw_sc[pl.ds(row0, Bp), :]               # (Bp, 4H), aligned tile
        gates = x_t + jnp.dot(h, whh, preferred_element_type=jnp.float32)

        # Whole-vreg activations on the EUP; gate columns via static slices.
        sig = jax.nn.sigmoid(gates)
        th = jnp.tanh(gates)
        i_g = sig[:, 0:H]
        f_g = sig[:, H:2 * H]
        g_g = th[:, 2 * H:3 * H]
        o_g = sig[:, 3 * H:4 * H]

        c_new = f_g * c + i_g * g_g
        h_new = o_g * jnp.tanh(c_new)
        return (h_new, c_new)

    h0 = jnp.zeros((Bp, H), jnp.float32)
    c0 = jnp.zeros((Bp, H), jnp.float32)
    h_last, _ = lax.fori_loop(0, S, step, (h0, c0), unroll=True)

    # Fused Linear head on the last hidden state: (Bp, H) @ (H, P) + (1, P).
    o_ref[...] = (jnp.dot(h_last, wlin_ref[...],
                          preferred_element_type=jnp.float32)
                  + blin_ref[...])


def lstm_model_forward(x, params, *, hidden_dim, pred_len):
    """x: (B, seq_len, enc_in) float32. Returns (B, pred_len, pred_len)."""
    B, S, C = x.shape
    H = hidden_dim
    P = pred_len
    Bp = ((B + 7) // 8) * 8   # sublane-align the batch (zero-pad)

    # Time-major, batch padded to Bp, flattened to (S*Bp, C) so the kernel can
    # do one hoisted input-projection matmul and aligned per-step slices.
    x_tm = jnp.transpose(x, (1, 0, 2))                     # (S, B, C)
    x_tm = jnp.pad(x_tm, ((0, 0), (0, Bp - B), (0, 0)))    # (S, Bp, C)
    x_tm = x_tm.reshape(S * Bp, C)

    wih_t = params["w_ih"].T                        # (C, 4H)
    whh_t = params["w_hh"].T                        # (H, 4H)
    b = (params["b_ih"] + params["b_hh"])[None, :]  # (1, 4H)
    wlin_t = params["w_lin"].T                      # (H, P)
    blin = params["b_lin"][None, :]                 # (1, P)

    kernel = functools.partial(_lstm_kernel, seq_len=S, batch_padded=Bp,
                               hidden_dim=H)

    last_lin = pl.pallas_call(
        kernel,
        out_shape=jax.ShapeDtypeStruct((Bp, P), jnp.float32),
        grid=(1,),   # single invocation; recurrence lives inside the kernel
        in_specs=[
            pl.BlockSpec((S * Bp, C), lambda i: (0, 0)),     # x, all steps
            pl.BlockSpec((C, 4 * H), lambda i: (0, 0)),      # W_ih^T
            pl.BlockSpec((H, 4 * H), lambda i: (0, 0)),      # W_hh^T
            pl.BlockSpec((1, 4 * H), lambda i: (0, 0)),      # b_ih + b_hh
            pl.BlockSpec((H, P), lambda i: (0, 0)),          # W_lin^T
            pl.BlockSpec((1, P), lambda i: (0, 0)),          # b_lin
        ],
        out_specs=pl.BlockSpec((Bp, P), lambda i: (0, 0)),
        scratch_shapes=[
            pltpu.VMEM((S * Bp, 4 * H), jnp.float32),        # pre-projected gates
        ],
        compiler_params=pltpu.CompilerParams(
            dimension_semantics=("arbitrary",)),
    )(x_tm, wih_t, whh_t, b, wlin_t, blin)

    last_lin = last_lin[:B]   # drop sublane padding rows

    # individual=False: Linear(out[:, -1, :]).unsqueeze(1).expand(-1, pred_len, -1)
    return jnp.broadcast_to(last_lin[:, None, :], (B, P, P))


def lstm_model_reference(x, params, *, hidden_dim, pred_len):
    """Pure-JAX reference matching torch.nn.LSTM semantics."""
    B, S, C = x.shape
    H = hidden_dim

    def step(carry, x_t):
        h, c = carry
        gates = (x_t @ params["w_ih"].T + params["b_ih"]
                 + h @ params["w_hh"].T + params["b_hh"])
        i_g = jax.nn.sigmoid(gates[:, 0:H])
        f_g = jax.nn.sigmoid(gates[:, H:2 * H])
        g_g = jnp.tanh(gates[:, 2 * H:3 * H])
        o_g = jax.nn.sigmoid(gates[:, 3 * H:4 * H])
        c_new = f_g * c + i_g * g_g
        h_new = o_g * jnp.tanh(c_new)
        return (h_new, c_new), h_new

    h0 = jnp.zeros((B, H), jnp.float32)
    c0 = jnp.zeros((B, H), jnp.float32)
    (h_last, _), _ = lax.scan(step, (h0, c0), jnp.transpose(x, (1, 0, 2)))
    lin = h_last @ params["w_lin"].T + params["b_lin"]
    return jnp.broadcast_to(lin[:, None, :], (B, pred_len, pred_len))


def make_params(key, *, enc_in, hidden_dim, pred_len):
    """Deterministic init mimicking PyTorch's U(-1/sqrt(H), 1/sqrt(H))."""
    H, C, P = hidden_dim, enc_in, pred_len
    ks = jax.random.split(key, 6)
    bound = 1.0 / np.sqrt(H)
    u = lambda k, shape: jax.random.uniform(k, shape, jnp.float32, -bound, bound)
    return {
        "w_ih": u(ks[0], (4 * H, C)),
        "w_hh": u(ks[1], (4 * H, H)),
        "b_ih": u(ks[2], (4 * H,)),
        "b_hh": u(ks[3], (4 * H,)),
        "w_lin": u(ks[4], (P, H)),
        "b_lin": u(ks[5], (P,)),
    }


if __name__ == "__main__":
    # configs: seq_len=8, pred_len=4, hidden_dim=32, enc_in=4, individual=False
    B, SEQ, CHANNELS, HIDDEN, PRED = 2, 8, 4, 32, 4

    key = jax.random.PRNGKey(0)
    kx, kp = jax.random.split(key)
    x = jax.random.normal(kx, (B, SEQ, CHANNELS), jnp.float32)
    params = make_params(kp, enc_in=CHANNELS, hidden_dim=HIDDEN, pred_len=PRED)

    out = lstm_model_forward(x, params, hidden_dim=HIDDEN, pred_len=PRED)
    out = jax.block_until_ready(out)

    ref = lstm_model_reference(x, params, hidden_dim=HIDDEN, pred_len=PRED)
    np.testing.assert_allclose(np.asarray(out), np.asarray(ref),
                               rtol=1e-5, atol=1e-5)
    assert out.shape == (B, PRED, PRED)
    print("KERNEL_OK")
</pallas_src>

<mosaic_0001>
module attributes {stable_mosaic.version = 11 : i64} {
  func.func @_lstm_kernel(%arg0: i32, %arg1: memref<64x4xf32, #tpu.memory_space<vmem>>, %arg2: memref<4x128xf32, #tpu.memory_space<vmem>>, %arg3: memref<32x128xf32, #tpu.memory_space<vmem>>, %arg4: memref<1x128xf32, #tpu.memory_space<vmem>>, %arg5: memref<32x4xf32, #tpu.memory_space<vmem>>, %arg6: memref<1x4xf32, #tpu.memory_space<vmem>>, %arg7: memref<8x4xf32, #tpu.memory_space<vmem>>, %arg8: memref<64x128xf32, #tpu.memory_space<vmem>>) attributes {dimension_semantics = [#tpu.dimension_semantics<arbitrary>], iteration_bounds = array<i64: 1>, scalar_prefetch = 0 : i64, scratch_operands = 1 : i64, tpu.core_type = #tpu.core_type<tc>, window_params = [{pipeline_mode = #tpu.pipeline_mode<synchronous>, transform_indices = @transform_0, window_bounds = array<i64: 64, 4>}, {pipeline_mode = #tpu.pipeline_mode<synchronous>, transform_indices = @transform_1, window_bounds = array<i64: 4, 128>}, {pipeline_mode = #tpu.pipeline_mode<synchronous>, transform_indices = @transform_2, window_bounds = array<i64: 32, 128>}, {pipeline_mode = #tpu.pipeline_mode<synchronous>, transform_indices = @transform_3, window_bounds = array<i64: 1, 128>}, {pipeline_mode = #tpu.pipeline_mode<synchronous>, transform_indices = @transform_4, window_bounds = array<i64: 32, 4>}, {pipeline_mode = #tpu.pipeline_mode<synchronous>, transform_indices = @transform_5, window_bounds = array<i64: 1, 4>}, {pipeline_mode = #tpu.pipeline_mode<synchronous>, transform_indices = @transform_6, window_bounds = array<i64: 8, 4>}]} {
    %c0 = arith.constant 0 : index
    %c0_0 = arith.constant 0 : index
    %0 = vector.load %arg1[%c0, %c0_0] : memref<64x4xf32, #tpu.memory_space<vmem>>, vector<64x4xf32>
    %c0_1 = arith.constant 0 : index
    %c0_2 = arith.constant 0 : index
    %1 = vector.load %arg2[%c0_1, %c0_2] : memref<4x128xf32, #tpu.memory_space<vmem>>, vector<4x128xf32>
    %cst = arith.constant dense<0.000000e+00> : vector<64x128xf32>
    %2 = tpu.matmul %0, %1, %cst {dimension_numbers = #tpu.dot_dimension_numbers<[1], [0], [0], [1], [0, 0, 1, 1], [], []>} : vector<64x4xf32>, vector<4x128xf32>, vector<64x128xf32> -> vector<64x128xf32>
    %c0_3 = arith.constant 0 : index
    %c0_4 = arith.constant 0 : index
    %3 = vector.load %arg4[%c0_3, %c0_4] : memref<1x128xf32, #tpu.memory_space<vmem>>, vector<1x128xf32>
    %4 = vector.broadcast %3 : vector<1x128xf32> to vector<64x128xf32>
    %5 = arith.addf %2, %4 : vector<64x128xf32>
    %c0_5 = arith.constant 0 : index
    %c0_6 = arith.constant 0 : index
    %6 = vector.load %arg8[%c0_5, %c0_6] : memref<64x128xf32, #tpu.memory_space<vmem>>, vector<64x128xf32>
    tpu.vector_store %arg8[%c0_5, %c0_6], %5 {strides = array<i32>} : memref<64x128xf32, #tpu.memory_space<vmem>>, vector<64x128xf32>,
    %c0_7 = arith.constant 0 : index
    %c0_8 = arith.constant 0 : index
    %7 = vector.load %arg3[%c0_7, %c0_8] : memref<32x128xf32, #tpu.memory_space<vmem>>, vector<32x128xf32>
    %cst_9 = arith.constant 0.000000e+00 : f32
    %8 = vector.broadcast %cst_9 : f32 to vector<8x32xf32>
    %cst_10 = arith.constant 0.000000e+00 : f32
    %9 = vector.broadcast %cst_10 : f32 to vector<8x32xf32>
    %c0_i32 = arith.constant 0 : i32
    %c8_i32 = arith.constant 8 : i32
    %10 = arith.muli %c0_i32, %c8_i32 : i32
    %11 = tpu.assume_multiple %10, 8 : i32
    %12 = arith.index_cast %11 : i32 to index
    %c0_11 = arith.constant 0 : index
    %13 = vector.load %arg8[%12, %c0_11] : memref<64x128xf32, #tpu.memory_space<vmem>>, vector<8x128xf32>
    %cst_12 = arith.constant dense<0.000000e+00> : vector<8x128xf32>
    %14 = tpu.matmul %8, %7, %cst_12 {dimension_numbers = #tpu.dot_dimension_numbers<[1], [0], [0], [1], [0, 0, 1, 1], [], []>} : vector<8x32xf32>, vector<32x128xf32>, vector<8x128xf32> -> vector<8x128xf32>
    %15 = arith.addf %13, %14 : vector<8x128xf32>
    %16 = arith.negf %15 : vector<8x128xf32>
    %17 = math.exp %16 : vector<8x128xf32>
    %cst_13 = arith.constant 1.000000e+00 : f32
    %18 = vector.broadcast %cst_13 : f32 to vector<8x128xf32>
    %19 = arith.addf %18, %17 : vector<8x128xf32>
    %20 = arith.divf %18, %19 : vector<8x128xf32>
    %21 = math.tanh %15 : vector<8x128xf32>
    %22 = vector.extract_strided_slice %20 {offsets = [0, 0], sizes = [8, 32], strides = [1, 1]} : vector<8x128xf32> to vector<8x32xf32>
    %23 = vector.extract_strided_slice %20 {offsets = [0, 32], sizes = [8, 32], strides = [1, 1]} : vector<8x128xf32> to vector<8x32xf32>
    %24 = vector.extract_strided_slice %21 {offsets = [0, 64], sizes = [8, 32], strides = [1, 1]} : vector<8x128xf32> to vector<8x32xf32>
    %25 = vector.extract_strided_slice %20 {offsets = [0, 96], sizes = [8, 32], strides = [1, 1]} : vector<8x128xf32> to vector<8x32xf32>
    %26 = arith.mulf %23, %9 : vector<8x32xf32>
    %27 = arith.mulf %22, %24 : vector<8x32xf32>
    %28 = arith.addf %26, %27 : vector<8x32xf32>
    %29 = math.tanh %28 : vector<8x32xf32>
    %30 = arith.mulf %25, %29 : vector<8x32xf32>
    %c1_i32 = arith.constant 1 : i32
    %c8_i32_14 = arith.constant 8 : i32
    %31 = arith.muli %c1_i32, %c8_i32_14 : i32
    %32 = tpu.assume_multiple %31, 8 : i32
    %33 = arith.index_cast %32 : i32 to index
    %c0_15 = arith.constant 0 : index
    %34 = vector.load %arg8[%33, %c0_15] : memref<64x128xf32, #tpu.memory_space<vmem>>, vector<8x128xf32>
    %cst_16 = arith.constant dense<0.000000e+00> : vector<8x128xf32>
    %35 = tpu.matmul %30, %7, %cst_16 {dimension_numbers = #tpu.dot_dimension_numbers<[1], [0], [0], [1], [0, 0, 1, 1], [], []>} : vector<8x32xf32>, vector<32x128xf32>, vector<8x128xf32> -> vector<8x128xf32>
    %36 = arith.addf %34, %35 : vector<8x128xf32>
    %37 = arith.negf %36 : vector<8x128xf32>
    %38 = math.exp %37 : vector<8x128xf32>
    %cst_17 = arith.constant 1.000000e+00 : f32
    %39 = vector.broadcast %cst_17 : f32 to vector<8x128xf32>
    %40 = arith.addf %39, %38 : vector<8x128xf32>
    %41 = arith.divf %39, %40 : vector<8x128xf32>
    %42 = math.tanh %36 : vector<8x128xf32>
    %43 = vector.extract_strided_slice %41 {offsets = [0, 0], sizes = [8, 32], strides = [1, 1]} : vector<8x128xf32> to vector<8x32xf32>
    %44 = vector.extract_strided_slice %41 {offsets = [0, 32], sizes = [8, 32], strides = [1, 1]} : vector<8x128xf32> to vector<8x32xf32>
    %45 = vector.extract_strided_slice %42 {offsets = [0, 64], sizes = [8, 32], strides = [1, 1]} : vector<8x128xf32> to vector<8x32xf32>
    %46 = vector.extract_strided_slice %41 {offsets = [0, 96], sizes = [8, 32], strides = [1, 1]} : vector<8x128xf32> to vector<8x32xf32>
    %47 = arith.mulf %44, %28 : vector<8x32xf32>
    %48 = arith.mulf %43, %45 : vector<8x32xf32>
    %49 = arith.addf %47, %48 : vector<8x32xf32>
    %50 = math.tanh %49 : vector<8x32xf32>
    %51 = arith.mulf %46, %50 : vector<8x32xf32>
    %c2_i32 = arith.constant 2 : i32
    %c8_i32_18 = arith.constant 8 : i32
    %52 = arith.muli %c2_i32, %c8_i32_18 : i32
    %53 = tpu.assume_multiple %52, 8 : i32
    %54 = arith.index_cast %53 : i32 to index
    %c0_19 = arith.constant 0 : index
    %55 = vector.load %arg8[%54, %c0_19] : memref<64x128xf32, #tpu.memory_space<vmem>>, vector<8x128xf32>
    %cst_20 = arith.constant dense<0.000000e+00> : vector<8x128xf32>
    %56 = tpu.matmul %51, %7, %cst_20 {dimension_numbers = #tpu.dot_dimension_numbers<[1], [0], [0], [1], [0, 0, 1, 1], [], []>} : vector<8x32xf32>, vector<32x128xf32>, vector<8x128xf32> -> vector<8x128xf32>
    %57 = arith.addf %55, %56 : vector<8x128xf32>
    %58 = arith.negf %57 : vector<8x128xf32>
    %59 = math.exp %58 : vector<8x128xf32>
    %cst_21 = arith.constant 1.000000e+00 : f32
    %60 = vector.broadcast %cst_21 : f32 to vector<8x128xf32>
    %61 = arith.addf %60, %59 : vector<8x128xf32>
    %62 = arith.divf %60, %61 : vector<8x128xf32>
    %63 = math.tanh %57 : vector<8x128xf32>
    %64 = vector.extract_strided_slice %62 {offsets = [0, 0], sizes = [8, 32], strides = [1, 1]} : vector<8x128xf32> to vector<8x32xf32>
    %65 = vector.extract_strided_slice %62 {offsets = [0, 32], sizes = [8, 32], strides = [1, 1]} : vector<8x128xf32> to vector<8x32xf32>
    %66 = vector.extract_strided_slice %63 {offsets = [0, 64], sizes = [8, 32], strides = [1, 1]} : vector<8x128xf32> to vector<8x32xf32>
    %67 = vector.extract_strided_slice %62 {offsets = [0, 96], sizes = [8, 32], strides = [1, 1]} : vector<8x128xf32> to vector<8x32xf32>
    %68 = arith.mulf %65, %49 : vector<8x32xf32>
    %69 = arith.mulf %64, %66 : vector<8x32xf32>
    %70 = arith.addf %68, %69 : vector<8x32xf32>
    %71 = math.tanh %70 : vector<8x32xf32>
    %72 = arith.mulf %67, %71 : vector<8x32xf32>
    %c3_i32 = arith.constant 3 : i32
    %c8_i32_22 = arith.constant 8 : i32
    %73 = arith.muli %c3_i32, %c8_i32_22 : i32
    %74 = tpu.assume_multiple %73, 8 : i32
    %75 = arith.index_cast %74 : i32 to index
    %c0_23 = arith.constant 0 : index
    %76 = vector.load %arg8[%75, %c0_23] : memref<64x128xf32, #tpu.memory_space<vmem>>, vector<8x128xf32>
    %cst_24 = arith.constant dense<0.000000e+00> : vector<8x128xf32>
    %77 = tpu.matmul %72, %7, %cst_24 {dimension_numbers = #tpu.dot_dimension_numbers<[1], [0], [0], [1], [0, 0, 1, 1], [], []>} : vector<8x32xf32>, vector<32x128xf32>, vector<8x128xf32> -> vector<8x128xf32>
    %78 = arith.addf %76, %77 : vector<8x128xf32>
    %79 = arith.negf %78 : vector<8x128xf32>
    %80 = math.exp %79 : vector<8x128xf32>
    %cst_25 = arith.constant 1.000000e+00 : f32
    %81 = vector.broadcast %cst_25 : f32 to vector<8x128xf32>
    %82 = arith.addf %81, %80 : vector<8x128xf32>
    %83 = arith.divf %81, %82 : vector<8x128xf32>
    %84 = math.tanh %78 : vector<8x128xf32>
    %85 = vector.extract_strided_slice %83 {offsets = [0, 0], sizes = [8, 32], strides = [1, 1]} : vector<8x128xf32> to vector<8x32xf32>
    %86 = vector.extract_strided_slice %83 {offsets = [0, 32], sizes = [8, 32], strides = [1, 1]} : vector<8x128xf32> to vector<8x32xf32>
    %87 = vector.extract_strided_slice %84 {offsets = [0, 64], sizes = [8, 32], strides = [1, 1]} : vector<8x128xf32> to vector<8x32xf32>
    %88 = vector.extract_strided_slice %83 {offsets = [0, 96], sizes = [8, 32], strides = [1, 1]} : vector<8x128xf32> to vector<8x32xf32>
    %89 = arith.mulf %86, %70 : vector<8x32xf32>
    %90 = arith.mulf %85, %87 : vector<8x32xf32>
    %91 = arith.addf %89, %90 : vector<8x32xf32>
    %92 = math.tanh %91 : vector<8x32xf32>
    %93 = arith.mulf %88, %92 : vector<8x32xf32>
    %c4_i32 = arith.constant 4 : i32
    %c8_i32_26 = arith.constant 8 : i32
    %94 = arith.muli %c4_i32, %c8_i32_26 : i32
    %95 = tpu.assume_multiple %94, 8 : i32
    %96 = arith.index_cast %95 : i32 to index
    %c0_27 = arith.constant 0 : index
    %97 = vector.load %arg8[%96, %c0_27] : memref<64x128xf32, #tpu.memory_space<vmem>>, vector<8x128xf32>
    %cst_28 = arith.constant dense<0.000000e+00> : vector<8x128xf32>
    %98 = tpu.matmul %93, %7, %cst_28 {dimension_numbers = #tpu.dot_dimension_numbers<[1], [0], [0], [1], [0, 0, 1, 1], [], []>} : vector<8x32xf32>, vector<32x128xf32>, vector<8x128xf32> -> vector<8x128xf32>
    %99 = arith.addf %97, %98 : vector<8x128xf32>
    %100 = arith.negf %99 : vector<8x128xf32>
    %101 = math.exp %100 : vector<8x128xf32>
    %cst_29 = arith.constant 1.000000e+00 : f32
    %102 = vector.broadcast %cst_29 : f32 to vector<8x128xf32>
    %103 = arith.addf %102, %101 : vector<8x128xf32>
    %104 = arith.divf %102, %103 : vector<8x128xf32>
    %105 = math.tanh %99 : vector<8x128xf32>
    %106 = vector.extract_strided_slice %104 {offsets = [0, 0], sizes = [8, 32], strides = [1, 1]} : vector<8x128xf32> to vector<8x32xf32>
    %107 = vector.extract_strided_slice %104 {offsets = [0, 32], sizes = [8, 32], strides = [1, 1]} : vector<8x128xf32> to vector<8x32xf32>
    %108 = vector.extract_strided_slice %105 {offsets = [0, 64], sizes = [8, 32], strides = [1, 1]} : vector<8x128xf32> to vector<8x32xf32>
    %109 = vector.extract_strided_slice %104 {offsets = [0, 96], sizes = [8, 32], strides = [1, 1]} : vector<8x128xf32> to vector<8x32xf32>
    %110 = arith.mulf %107, %91 : vector<8x32xf32>
    %111 = arith.mulf %106, %108 : vector<8x32xf32>
    %112 = arith.addf %110, %111 : vector<8x32xf32>
    %113 = math.tanh %112 : vector<8x32xf32>
    %114 = arith.mulf %109, %113 : vector<8x32xf32>
    %c5_i32 = arith.constant 5 : i32
    %c8_i32_30 = arith.constant 8 : i32
    %115 = arith.muli %c5_i32, %c8_i32_30 : i32
    %116 = tpu.assume_multiple %115, 8 : i32
    %117 = arith.index_cast %116 : i32 to index
    %c0_31 = arith.constant 0 : index
    %118 = vector.load %arg8[%117, %c0_31] : memref<64x128xf32, #tpu.memory_space<vmem>>, vector<8x128xf32>
    %cst_32 = arith.constant dense<0.000000e+00> : vector<8x128xf32>
    %119 = tpu.matmul %114, %7, %cst_32 {dimension_numbers = #tpu.dot_dimension_numbers<[1], [0], [0], [1], [0, 0, 1, 1], [], []>} : vector<8x32xf32>, vector<32x128xf32>, vector<8x128xf32> -> vector<8x128xf32>
    %120 = arith.addf %118, %119 : vector<8x128xf32>
    %121 = arith.negf %120 : vector<8x128xf32>
    %122 = math.exp %121 : vector<8x128xf32>
    %cst_33 = arith.constant 1.000000e+00 : f32
    %123 = vector.broadcast %cst_33 : f32 to vector<8x128xf32>
    %124 = arith.addf %123, %122 : vector<8x128xf32>
    %125 = arith.divf %123, %124 : vector<8x128xf32>
    %126 = math.tanh %120 : vector<8x128xf32>
    %127 = vector.extract_strided_slice %125 {offsets = [0, 0], sizes = [8, 32], strides = [1, 1]} : vector<8x128xf32> to vector<8x32xf32>
    %128 = vector.extract_strided_slice %125 {offsets = [0, 32], sizes = [8, 32], strides = [1, 1]} : vector<8x128xf32> to vector<8x32xf32>
    %129 = vector.extract_strided_slice %126 {offsets = [0, 64], sizes = [8, 32], strides = [1, 1]} : vector<8x128xf32> to vector<8x32xf32>
    %130 = vector.extract_strided_slice %125 {offsets = [0, 96], sizes = [8, 32], strides = [1, 1]} : vector<8x128xf32> to vector<8x32xf32>
    %131 = arith.mulf %128, %112 : vector<8x32xf32>
    %132 = arith.mulf %127, %129 : vector<8x32xf32>
    %133 = arith.addf %131, %132 : vector<8x32xf32>
    %134 = math.tanh %133 : vector<8x32xf32>
    %135 = arith.mulf %130, %134 : vector<8x32xf32>
    %c6_i32 = arith.constant 6 : i32
    %c8_i32_34 = arith.constant 8 : i32
    %136 = arith.muli %c6_i32, %c8_i32_34 : i32
    %137 = tpu.assume_multiple %136, 8 : i32
    %138 = arith.index_cast %137 : i32 to index
    %c0_35 = arith.constant 0 : index
    %139 = vector.load %arg8[%138, %c0_35] : memref<64x128xf32, #tpu.memory_space<vmem>>, vector<8x128xf32>
    %cst_36 = arith.constant dense<0.000000e+00> : vector<8x128xf32>
    %140 = tpu.matmul %135, %7, %cst_36 {dimension_numbers = #tpu.dot_dimension_numbers<[1], [0], [0], [1], [0, 0, 1, 1], [], []>} : vector<8x32xf32>, vector<32x128xf32>, vector<8x128xf32> -> vector<8x128xf32>
    %141 = arith.addf %139, %140 : vector<8x128xf32>
    %142 = arith.negf %141 : vector<8x128xf32>
    %143 = math.exp %142 : vector<8x128xf32>
    %cst_37 = arith.constant 1.000000e+00 : f32
    %144 = vector.broadcast %cst_37 : f32 to vector<8x128xf32>
    %145 = arith.addf %144, %143 : vector<8x128xf32>
    %146 = arith.divf %144, %145 : vector<8x128xf32>
    %147 = math.tanh %141 : vector<8x128xf32>
    %148 = vector.extract_strided_slice %146 {offsets = [0, 0], sizes = [8, 32], strides = [1, 1]} : vector<8x128xf32> to vector<8x32xf32>
    %149 = vector.extract_strided_slice %146 {offsets = [0, 32], sizes = [8, 32], strides = [1, 1]} : vector<8x128xf32> to vector<8x32xf32>
    %150 = vector.extract_strided_slice %147 {offsets = [0, 64], sizes = [8, 32], strides = [1, 1]} : vector<8x128xf32> to vector<8x32xf32>
    %151 = vector.extract_strided_slice %146 {offsets = [0, 96], sizes = [8, 32], strides = [1, 1]} : vector<8x128xf32> to vector<8x32xf32>
    %152 = arith.mulf %149, %133 : vector<8x32xf32>
    %153 = arith.mulf %148, %150 : vector<8x32xf32>
    %154 = arith.addf %152, %153 : vector<8x32xf32>
    %155 = math.tanh %154 : vector<8x32xf32>
    %156 = arith.mulf %151, %155 : vector<8x32xf32>
    %c7_i32 = arith.constant 7 : i32
    %c8_i32_38 = arith.constant 8 : i32
    %157 = arith.muli %c7_i32, %c8_i32_38 : i32
    %158 = tpu.assume_multiple %157, 8 : i32
    %159 = arith.index_cast %158 : i32 to index
    %c0_39 = arith.constant 0 : index
    %160 = vector.load %arg8[%159, %c0_39] : memref<64x128xf32, #tpu.memory_space<vmem>>, vector<8x128xf32>
    %cst_40 = arith.constant dense<0.000000e+00> : vector<8x128xf32>
    %161 = tpu.matmul %156, %7, %cst_40 {dimension_numbers = #tpu.dot_dimension_numbers<[1], [0], [0], [1], [0, 0, 1, 1], [], []>} : vector<8x32xf32>, vector<32x128xf32>, vector<8x128xf32> -> vector<8x128xf32>
    %162 = arith.addf %160, %161 : vector<8x128xf32>
    %163 = arith.negf %162 : vector<8x128xf32>
    %164 = math.exp %163 : vector<8x128xf32>
    %cst_41 = arith.constant 1.000000e+00 : f32
    %165 = vector.broadcast %cst_41 : f32 to vector<8x128xf32>
    %166 = arith.addf %165, %164 : vector<8x128xf32>
    %167 = arith.divf %165, %166 : vector<8x128xf32>
    %168 = math.tanh %162 : vector<8x128xf32>
    %169 = vector.extract_strided_slice %167 {offsets = [0, 0], sizes = [8, 32], strides = [1, 1]} : vector<8x128xf32> to vector<8x32xf32>
    %170 = vector.extract_strided_slice %167 {offsets = [0, 32], sizes = [8, 32], strides = [1, 1]} : vector<8x128xf32> to vector<8x32xf32>
    %171 = vector.extract_strided_slice %168 {offsets = [0, 64], sizes = [8, 32], strides = [1, 1]} : vector<8x128xf32> to vector<8x32xf32>
    %172 = vector.extract_strided_slice %167 {offsets = [0, 96], sizes = [8, 32], strides = [1, 1]} : vector<8x128xf32> to vector<8x32xf32>
    %173 = arith.mulf %170, %154 : vector<8x32xf32>
    %174 = arith.mulf %169, %171 : vector<8x32xf32>
    %175 = arith.addf %173, %174 : vector<8x32xf32>
    %176 = math.tanh %175 : vector<8x32xf32>
    %177 = arith.mulf %172, %176 : vector<8x32xf32>
    %c8_i32_42 = arith.constant 8 : i32
    %c0_43 = arith.constant 0 : index
    %c0_44 = arith.constant 0 : index
    %178 = vector.load %arg5[%c0_43, %c0_44] : memref<32x4xf32, #tpu.memory_space<vmem>>, vector<32x4xf32>
    %cst_45 = arith.constant dense<0.000000e+00> : vector<8x4xf32>
    %179 = tpu.matmul %177, %178, %cst_45 {dimension_numbers = #tpu.dot_dimension_numbers<[1], [0], [0], [1], [0, 0, 1, 1], [], []>} : vector<8x32xf32>, vector<32x4xf32>, vector<8x4xf32> -> vector<8x4xf32>
    %c0_46 = arith.constant 0 : index
    %c0_47 = arith.constant 0 : index
    %180 = vector.load %arg6[%c0_46, %c0_47] : memref<1x4xf32, #tpu.memory_space<vmem>>, vector<1x4xf32>
    %181 = vector.broadcast %180 : vector<1x4xf32> to vector<8x4xf32>
    %182 = arith.addf %179, %181 : vector<8x4xf32>
    %c0_48 = arith.constant 0 : index
    %c0_49 = arith.constant 0 : index
    %183 = vector.load %arg7[%c0_48, %c0_49] : memref<8x4xf32, #tpu.memory_space<vmem>>, vector<8x4xf32>
    tpu.vector_store %arg7[%c0_48, %c0_49], %182 {strides = array<i32>} : memref<8x4xf32, #tpu.memory_space<vmem>>, vector<8x4xf32>,
    return
  }
  func.func @transform_0(%arg0: i32) -> (i32, i32) {
    %c0_i32 = arith.constant 0 : i32
    %c0_i32_0 = arith.constant 0 : i32
    %c0_i32_1 = arith.constant 0 : i32
    return %c0_i32, %c0_i32_0 : i32, i32
  }
  func.func @transform_1(%arg0: i32) -> (i32, i32) {
    %c0_i32 = arith.constant 0 : i32
    %c0_i32_0 = arith.constant 0 : i32
    %c0_i32_1 = arith.constant 0 : i32
    return %c0_i32, %c0_i32_0 : i32, i32
  }
  func.func @transform_2(%arg0: i32) -> (i32, i32) {
    %c0_i32 = arith.constant 0 : i32
    %c0_i32_0 = arith.constant 0 : i32
    %c0_i32_1 = arith.constant 0 : i32
    return %c0_i32, %c0_i32_0 : i32, i32
  }
  func.func @transform_3(%arg0: i32) -> (i32, i32) {
    %c0_i32 = arith.constant 0 : i32
    %c0_i32_0 = arith.constant 0 : i32
    %c0_i32_1 = arith.constant 0 : i32
    return %c0_i32, %c0_i32_0 : i32, i32
  }
  func.func @transform_4(%arg0: i32) -> (i32, i32) {
    %c0_i32 = arith.constant 0 : i32
    %c0_i32_0 = arith.constant 0 : i32
    %c0_i32_1 = arith.constant 0 : i32
    return %c0_i32, %c0_i32_0 : i32, i32
  }
  func.func @transform_5(%arg0: i32) -> (i32, i32) {
    %c0_i32 = arith.constant 0 : i32
    %c0_i32_0 = arith.constant 0 : i32
    %c0_i32_1 = arith.constant 0 : i32
    return %c0_i32, %c0_i32_0 : i32, i32
  }
  func.func @transform_6(%arg0: i32) -> (i32, i32) {
    %c0_i32 = arith.constant 0 : i32
    %c0_i32_0 = arith.constant 0 : i32
    %c0_i32_1 = arith.constant 0 : i32
    return %c0_i32, %c0_i32_0 : i32, i32
  }
}

</mosaic_0001>

<bundles_post_ra>
// kernel: tpu_custom_call.1
= control target key start
LH: loop header
LB: loop body
LE: loop exit
PB: predicated region body
PF: predicated region fallthrough
CT: control target
= control target key end

     0   :  { %vm64_vm0 = vcmask 1043456   ;;  %vm39_vm1 = vcmask 31744   ;;  %v1352_v0 = vmov 0.0   ;;  %vm1353_vm2 = vmmov 0   ;;  %s1354_s11 = smov 64   ;;  %s1617_s1 = inlined_call_operand.vmem [shape: f32[4,128], index: 1, kind: input, shape index: {}]   ;;  %s1618_s2 = inlined_call_operand.vmem [shape: f32[32,128], index: 2, kind: input, shape index: {}]   ;;  %s1619_s0 = inlined_call_operand.vmem [shape: f32[64,4], index: 0, kind: input, shape index: {}]   ;;  %s1620_s3 = inlined_call_operand.vmem [shape: f32[1,128], index: 3, kind: input, shape index: {}]   ;;  %s1621_s4 = inlined_call_operand.vmem [shape: f32[32,4], index: 4, kind: input, shape index: {}]   ;;  %s1622_s5 = inlined_call_operand.vmem [shape: f32[1,4], index: 5, kind: input, shape index: {}]   ;;  %s1623_s6 = inlined_call_operand.vmem [shape: f32[8,4], index: 6, kind: output, shape index: {}]  }
   0x1   :  { %1185 = vmatprep.subr.mxu1 %v1352_v0  ;;  %v31_v1 = vld [vmem:[%s1617_s1] sm:$0xf]  ;;  %v1398_v2 = vld [vmem:[%s1618_s2 + $0x18] sm:$0xff]  ;;  %1193 = vmatprep.mubr.msk.f32.mxu1 %vm1353_vm2, %v1352_v0  ;;  %v24_v4 = vld [vmem:[%s1619_s0 + $0x8] sm:$0xff]  ;;  %vm186_vm3 = vcmask 261120  }
   0x2   :  { %v23_v3 = vld [vmem:[%s1619_s0] sm:$0xff]  ;;  %1171 = vmatprep.subr.msk.mxu0 %vm64_vm0, %v31_v1  ;;  %1186 = vmatpush3.msra.mxu1 %v1398_v2  ;;  %v1412_v5 = vld [vmem:[%s1618_s2 + $0x10] sm:$0xff]  ;;  %v1420_v6 = vld [vmem:[%s1618_s2 + $0x8] sm:$0xff] }
   0x3   :  { %1172 = vmatpush3.msk.msra.mxu0 %vm64_vm0, %v31_v1  ;;  %1173 = vmatprep.mubr.msk.f32.mxu0 %vm39_vm1, %v23_v3  ;;  %v1428_v7 = vld [vmem:[%s1618_s2] sm:$0xff]  ;;  %v25_v43 = vld [vmem:[%s1619_s0 + $0x10] sm:$0xff]  ;;  %v26_v44 = vld [vmem:[%s1619_s0 + $0x18] sm:$0xff] }
   0x4   :  { %1187 = vmatprep.subr.mxu1 %v1352_v0  ;;  %1174 = vmatmul.mubr.msk.f32.vlgmr.msra.gmra.mxu0 %vm39_vm1, %v24_v4  ;;  %v1456_v9 = vld [vmem:[%s1620_s3] ss:$0 sm:$0xff]  ;;  %s1355_s3 = smov 32   ;;  %v28_v46 = vld [vmem:[%s1619_s0 + $0x28] sm:$0xff]  ;;  %v29_v47 = vld [vmem:[%s1619_s0 + $0x30] sm:$0xff] }
   0x5   :  { %1188 = vmatpush3.msra.mxu1 %v1412_v5  ;;  %1207 = vmatprep.subr.mxu0 %v1352_v0  ;;  %v27_v45 = vld [vmem:[%s1619_s0 + $0x20] sm:$0xff]  ;;  %v30_v48 = vld [vmem:[%s1619_s0 + $0x38] sm:$0xff] }
   0x6   :  { %1189 = vmatprep.subr.mxu1 %v1352_v0  ;;  %1208 = vmatpush3.msra.mxu0 %v1398_v2 }
   0x7   :  { %1190 = vmatpush3.msra.mxu1 %v1420_v6  ;;  %1209 = vmatprep.subr.mxu0 %v1352_v0 }
   0x8   :  { %1191 = vmatprep.subr.mxu1 %v1352_v0  ;;  %1210 = vmatpush3.msra.mxu0 %v1412_v5 }
   0x9   :  { %1192 = vmatpush3.msra.mxu1 %v1428_v7  ;;  %1211 = vmatprep.subr.mxu0 %v1352_v0 }
   0xa   :  { %1194 = vmatmul.mubr.f32.vlgmr.msra.gmra.mxu1 %v1352_v0  ;;  %1196 = vmatprep.subr.mxu1 %v1352_v0 }
   0xb   :  { %1197 = vmatpush3.msra.mxu1 %v1398_v2  ;;  %1204 = vmatprep.mubr.msk.f32.mxu1 %vm1353_vm2, %v1352_v0 }
   0xc   :  { %1198 = vmatprep.subr.mxu1 %v1352_v0  ;;  %1212 = vmatpush3.msra.mxu0 %v1420_v6 }
   0xd   :  { %1199 = vmatpush3.msra.mxu1 %v1412_v5  ;;  %1213 = vmatprep.subr.mxu0 %v1352_v0 }
   0xe   :  { %1200 = vmatprep.subr.mxu1 %v1352_v0  ;;  %1214 = vmatpush3.msra.mxu0 %v1428_v7 }
   0xf   :  { %1201 = vmatpush3.msra.mxu1 %v1420_v6  ;;  %1229 = vmatprep.subr.mxu0 %v1352_v0 }
  0x10   :  { %1202 = vmatprep.subr.mxu1 %v1352_v0  ;;  %1176 = vmatprep.mubr.msk.f32.mxu0 %vm39_vm1, %v25_v43 }
  0x11   :  { %1203 = vmatpush3.msra.mxu1 %v1428_v7  ;;  %1177 = vmatmul.mubr.msk.f32.gmra.mxu0 %vm39_vm1, %v26_v44 }
  0x12   :  { %1218 = vmatprep.subr.mxu1 %v1352_v0  ;;  %1179 = vmatprep.mubr.msk.f32.mxu0 %vm39_vm1, %v27_v45 }
  0x15   :  { %1180 = vmatmul.mubr.msk.f32.gmra.mxu0 %vm39_vm1, %v28_v46 }
  0x16   :  { %1182 = vmatprep.mubr.msk.f32.mxu0 %vm39_vm1, %v29_v47 }
  0x19   :  { %1183 = vmatmul.mubr.msk.f32.gmra.mxu0 %vm39_vm1, %v30_v48 }
  0x1a   :  { %1215 = vmatprep.mubr.msk.f32.mxu0 %vm1353_vm2, %v1352_v0 }
  0xc4   :  { %v1175_v8 = vpop.f32.mrf.mxu0 }
  0xc5   :  { %v140_v29 = vadd.f32 %v1175_v8, %v1456_v9 }
  0xc6   :  { %v134_v10 = vpop.f32.mrf.mxu0 }
  0xc7   :  { %v135_v11 = vadd.f32 %v1456_v9, %v134_v10 }
  0xca   :  { %v256_v12 = vpop.f32.mrf.mxu1 }
  0xcb   :  { %v260_v13 = vadd.f32 %v256_v12, %v135_v11 }
  0xcc   :  { %v1195_v14 = vpop.f32.mrf.mxu1 }
  0xcd   :  { %1288 = vtanh.f32 %v260_v13  ;;  %v1100_v16 = vmul.f32 -1.442695, %v260_v13 }
  0xcf   :  { %1290 = vpow2.f32 %v1100_v16 }
  0xd1   :  { %v1178_v53 = vpop.f32.mrf.mxu0 }
  0xd3   :  { %v144_v54 = vpop.f32.mrf.mxu0 }
  0xd4   :  { %v145_v59 = vadd.f32 %v1456_v9, %v144_v54 }
  0xd5   :  { %v1516_v55 = vpop.f32.mrf.mxu0 }
  0xd7   :  { %v1518_v56 = vpop.f32.mrf.mxu0 }
  0xd9   :  { %v1520_v57 = vpop.f32.mrf.mxu0 }
  0xda   :  { %v1289_v15 = vpop.eup %1288 }
  0xdb   :  { %270 = vrot.lane.b32.xlu0 %v1289_v15, %s1354_s11  ;;  %v1522_v58 = vpop.f32.mrf.mxu0 }
  0xdc   :  { %v1291_v17 = vpop.eup %1290 }
  0xdd   :  { %v264_v18 = vadd.f32 1.0, %v1291_v17 }
  0xdf   :  { %1292 = vrcp.f32 %v264_v18 }
  0xec   :  { %v1293_v19 = vpop.eup %1292 }
  0xed   :  { %v268_v22 = vmul.f32 0.0, %v1293_v19 }
 0x14d   :  { %v271_v20 = vpop.permute.xlu0 %270 }
 0x14e   :  { %v273_v21 = vmul.f32 %v1293_v19, %v271_v20 }
 0x150   :  { %275 = vrot.lane.b32.xlu0 %v273_v21, %s1355_s3 }
 0x1c2   :  { %v276_v23 = vpop.permute.xlu0 %275 }
 0x1c3   :  { %v278_v24 = vadd.f32 %v276_v23, %v268_v22 }
 0x1c5   :  { %1294 = vtanh.f32 %v278_v24 }
 0x1d2   :  { %v1295_v25 = vpop.eup %1294 }
 0x1d3   :  { %281 = vrot.lane.b32.xlu1 %v1295_v25, %s1354_s11 }
 0x245   :  { %v282_v26 = vpop.permute.xlu1 %281 }
 0x246   :  { %v284_v27 = vmul.f32 %v1293_v19, %v282_v26  ;;  %v150_v19 = vadd.f32 %v1178_v53, %v1456_v9 }
 0x248   :  { %288 = vrot.lane.b32.xlu1 %v284_v27, %s1355_s3 }
 0x2ba   :  { %v289_v28 = vpop.permute.xlu1 %288 }
 0x2bb   :  { %1205 = vmatmul.mubr.msk.f32.vlgmr.msra.gmra.mxu1 %vm186_vm3, %v289_v28 }
 0x2bc   :  { %1219 = vmatpush3.msra.mxu1 %v1398_v2  ;;  %1226 = vmatprep.mubr.msk.f32.mxu1 %vm1353_vm2, %v1352_v0 }
 0x2bd   :  { %1220 = vmatprep.subr.mxu1 %v1352_v0 }
 0x2be   :  { %1221 = vmatpush3.msra.mxu1 %v1412_v5 }
 0x2bf   :  { %1222 = vmatprep.subr.mxu1 %v1352_v0 }
 0x2c0   :  { %1223 = vmatpush3.msra.mxu1 %v1420_v6 }
 0x2c1   :  { %1224 = vmatprep.subr.mxu1 %v1352_v0 }
 0x2c2   :  { %1225 = vmatpush3.msra.mxu1 %v1428_v7 }
 0x2c3   :  { %1240 = vmatprep.subr.mxu1 %v1352_v0 }
 0x37b   :  { %v358_v30 = vpop.f32.mrf.mxu1 }
 0x37c   :  { %v362_v31 = vadd.f32 %v358_v30, %v140_v29 }
 0x37d   :  { %v1206_v32 = vpop.f32.mrf.mxu1 }
 0x37e   :  { %1296 = vtanh.f32 %v362_v31  ;;  %v1102_v34 = vmul.f32 -1.442695, %v362_v31 }
 0x380   :  { %1298 = vpow2.f32 %v1102_v34 }
 0x38b   :  { %v1297_v33 = vpop.eup %1296 }
 0x38c   :  { %372 = vrot.lane.b32.xlu0 %v1297_v33, %s1354_s11 }
 0x38d   :  { %v1299_v35 = vpop.eup %1298 }
 0x38e   :  { %v366_v36 = vadd.f32 1.0, %v1299_v35 }
 0x390   :  { %1300 = vrcp.f32 %v366_v36 }
 0x39d   :  { %v1301_v37 = vpop.eup %1300 }
 0x39e   :  { %v370_v40 = vmul.f32 %v1301_v37, %v278_v24 }
 0x3fe   :  { %v373_v38 = vpop.permute.xlu0 %372 }
 0x3ff   :  { %v375_v39 = vmul.f32 %v1301_v37, %v373_v38 }
 0x401   :  { %377 = vrot.lane.b32.xlu1 %v375_v39, %s1355_s3 }
 0x473   :  { %v378_v41 = vpop.permute.xlu1 %377 }
 0x474   :  { %v380_v42 = vadd.f32 %v378_v41, %v370_v40 }
 0x476   :  { %1302 = vtanh.f32 %v380_v42 }
 0x483   :  { %v1303_v49 = vpop.eup %1302 }
 0x484   :  { %383 = vrot.lane.b32.xlu0 %v1303_v49, %s1354_s11 }
 0x4f6   :  { %v384_v50 = vpop.permute.xlu0 %383 }
 0x4f7   :  { %v386_v51 = vmul.f32 %v1301_v37, %v384_v50  ;;  %v155_v37 = vadd.f32 %v1456_v9, %v1518_v56  ;;  %v160_v56 = vadd.f32 %v1516_v55, %v1456_v9 }
 0x4f9   :  { %390 = vrot.lane.b32.xlu1 %v386_v51, %s1355_s3 }
 0x56b   :  { %v391_v52 = vpop.permute.xlu1 %390 }
 0x56c   :  { %1216 = vmatmul.mubr.msk.f32.vlgmr.msra.gmra.mxu0 %vm186_vm3, %v391_v52 }
 0x56d   :  { %1230 = vmatpush3.msra.mxu0 %v1398_v2  ;;  %1237 = vmatprep.mubr.msk.f32.mxu0 %vm1353_vm2, %v1352_v0 }
 0x56e   :  { %1231 = vmatprep.subr.mxu0 %v1352_v0 }
 0x56f   :  { %1232 = vmatpush3.msra.mxu0 %v1412_v5 }
 0x570   :  { %1233 = vmatprep.subr.mxu0 %v1352_v0 }
 0x571   :  { %1234 = vmatpush3.msra.mxu0 %v1420_v6 }
 0x572   :  { %1235 = vmatprep.subr.mxu0 %v1352_v0 }
 0x573   :  { %1236 = vmatpush3.msra.mxu0 %v1428_v7 }
 0x574   :  { %1251 = vmatprep.subr.mxu0 %v1352_v0 }
 0x62c   :  { %v460_v60 = vpop.f32.mrf.mxu0 }
 0x62d   :  { %v464_v61 = vadd.f32 %v460_v60, %v145_v59 }
 0x62e   :  { %v1217_v62 = vpop.f32.mrf.mxu0 }
 0x62f   :  { %1304 = vtanh.f32 %v464_v61  ;;  %v1104_v1 = vmul.f32 -1.442695, %v464_v61 }
 0x631   :  { %1306 = vpow2.f32 %v1104_v1 }
 0x63c   :  { %v1305_v63 = vpop.eup %1304 }
 0x63d   :  { %474 = vrot.lane.b32.xlu0 %v1305_v63, %s1354_s11 }
 0x63e   :  { %v1307_v3 = vpop.eup %1306 }
 0x63f   :  { %v468_v4 = vadd.f32 1.0, %v1307_v3 }
 0x641   :  { %1308 = vrcp.f32 %v468_v4 }
 0x64e   :  { %v1309_v8 = vpop.eup %1308 }
 0x64f   :  { %v472_v12 = vmul.f32 %v1309_v8, %v380_v42 }
 0x6af   :  { %v475_v10 = vpop.permute.xlu0 %474 }
 0x6b0   :  { %v477_v11 = vmul.f32 %v1309_v8, %v475_v10 }
 0x6b2   :  { %479 = vrot.lane.b32.xlu1 %v477_v11, %s1355_s3 }
 0x724   :  { %v480_v13 = vpop.permute.xlu1 %479 }
 0x725   :  { %v482_v14 = vadd.f32 %v480_v13, %v472_v12  ;;  %v165_v13 = vadd.f32 %v1456_v9, %v1522_v58 }
 0x727   :  { %1310 = vtanh.f32 %v482_v14 }
 0x734   :  { %v1311_v15 = vpop.eup %1310 }
 0x735   :  { %485 = vrot.lane.b32.xlu0 %v1311_v15, %s1354_s11 }
 0x7a7   :  { %v486_v16 = vpop.permute.xlu0 %485 }
 0x7a8   :  { %v488_v17 = vmul.f32 %v1309_v8, %v486_v16 }
 0x7aa   :  { %492 = vrot.lane.b32.xlu1 %v488_v17, %s1355_s3 }
 0x81c   :  { %v493_v18 = vpop.permute.xlu1 %492 }
 0x81d   :  { %1227 = vmatmul.mubr.msk.f32.vlgmr.msra.gmra.mxu1 %vm186_vm3, %v493_v18 }
 0x81e   :  { %1241 = vmatpush3.msra.mxu1 %v1398_v2  ;;  %1248 = vmatprep.mubr.msk.f32.mxu1 %vm1353_vm2, %v1352_v0 }
 0x81f   :  { %1242 = vmatprep.subr.mxu1 %v1352_v0 }
 0x820   :  { %1243 = vmatpush3.msra.mxu1 %v1412_v5 }
 0x821   :  { %1244 = vmatprep.subr.mxu1 %v1352_v0 }
 0x822   :  { %1245 = vmatpush3.msra.mxu1 %v1420_v6 }
 0x823   :  { %1246 = vmatprep.subr.mxu1 %v1352_v0 }
 0x824   :  { %1247 = vmatpush3.msra.mxu1 %v1428_v7 }
 0x825   :  { %1262 = vmatprep.subr.mxu1 %v1352_v0 }
 0x8dd   :  { %v562_v20 = vpop.f32.mrf.mxu1 }
 0x8de   :  { %v566_v21 = vadd.f32 %v562_v20, %v150_v19 }
 0x8df   :  { %v1228_v22 = vpop.f32.mrf.mxu1 }
 0x8e0   :  { %1312 = vtanh.f32 %v566_v21  ;;  %v1106_v24 = vmul.f32 -1.442695, %v566_v21 }
 0x8e2   :  { %1314 = vpow2.f32 %v1106_v24 }
 0x8ed   :  { %v1313_v23 = vpop.eup %1312 }
 0x8ee   :  { %576 = vrot.lane.b32.xlu0 %v1313_v23, %s1354_s11 }
 0x8ef   :  { %v1315_v25 = vpop.eup %1314 }
 0x8f0   :  { %v570_v26 = vadd.f32 1.0, %v1315_v25 }
 0x8f2   :  { %1316 = vrcp.f32 %v570_v26 }
 0x8ff   :  { %v1317_v27 = vpop.eup %1316 }
 0x900   :  { %v574_v30 = vmul.f32 %v1317_v27, %v482_v14 }
 0x960   :  { %v577_v28 = vpop.permute.xlu0 %576 }
 0x961   :  { %v579_v29 = vmul.f32 %v1317_v27, %v577_v28 }
 0x963   :  { %581 = vrot.lane.b32.xlu1 %v579_v29, %s1355_s3 }
 0x9d5   :  { %v582_v31 = vpop.permute.xlu1 %581 }
 0x9d6   :  { %v584_v32 = vadd.f32 %v582_v31, %v574_v30  ;;  %v170_v30 = vadd.f32 %v1520_v57, %v1456_v9  ;;  %v1002_v57 = vld [vmem:[%s1621_s4 + $0x18] sm:$0xff] }
 0x9d8   :  { %1318 = vtanh.f32 %v584_v32 }
 0x9e5   :  { %v1319_v33 = vpop.eup %1318 }
 0x9e6   :  { %587 = vrot.lane.b32.xlu0 %v1319_v33, %s1354_s11 }
 0xa58   :  { %v588_v34 = vpop.permute.xlu0 %587 }
 0xa59   :  { %v590_v35 = vmul.f32 %v1317_v27, %v588_v34 }
 0xa5b   :  { %594 = vrot.lane.b32.xlu1 %v590_v35, %s1355_s3 }
 0xacd   :  { %v595_v36 = vpop.permute.xlu1 %594 }
 0xace   :  { %1238 = vmatmul.mubr.msk.f32.vlgmr.msra.gmra.mxu0 %vm186_vm3, %v595_v36 }
 0xacf   :  { %1252 = vmatpush3.msra.mxu0 %v1398_v2  ;;  %1259 = vmatprep.mubr.msk.f32.mxu0 %vm1353_vm2, %v1352_v0 }
 0xad0   :  { %1253 = vmatprep.subr.mxu0 %v1352_v0 }
 0xad1   :  { %1254 = vmatpush3.msra.mxu0 %v1412_v5 }
 0xad2   :  { %1255 = vmatprep.subr.mxu0 %v1352_v0 }
 0xad3   :  { %1256 = vmatpush3.msra.mxu0 %v1420_v6 }
 0xad4   :  { %1257 = vmatprep.subr.mxu0 %v1352_v0 }
 0xad5   :  { %1258 = vmatpush3.msra.mxu0 %v1428_v7 }
 0xad6   :  { %1273 = vmatprep.subr.mxu0 %v1352_v0 }
 0xb8e   :  { %v664_v38 = vpop.f32.mrf.mxu0 }
 0xb8f   :  { %v668_v39 = vadd.f32 %v664_v38, %v155_v37 }
 0xb90   :  { %v1239_v40 = vpop.f32.mrf.mxu0 }
 0xb91   :  { %1320 = vtanh.f32 %v668_v39  ;;  %v1108_v42 = vmul.f32 -1.442695, %v668_v39 }
 0xb93   :  { %1322 = vpow2.f32 %v1108_v42 }
 0xb9e   :  { %v1321_v41 = vpop.eup %1320 }
 0xb9f   :  { %678 = vrot.lane.b32.xlu0 %v1321_v41, %s1354_s11 }
 0xba0   :  { %v1323_v43 = vpop.eup %1322 }
 0xba1   :  { %v672_v44 = vadd.f32 1.0, %v1323_v43  ;;  %v1001_v43 = vld [vmem:[%s1621_s4 + $0x10] sm:$0xff] }
 0xba3   :  { %1324 = vrcp.f32 %v672_v44  ;;  %v1000_v44 = vld [vmem:[%s1621_s4 + $0x8] sm:$0xff] }
 0xbb0   :  { %v1325_v45 = vpop.eup %1324 }
 0xbb1   :  { %v676_v48 = vmul.f32 %v1325_v45, %v584_v32 }
 0xc11   :  { %v679_v46 = vpop.permute.xlu0 %678 }
 0xc12   :  { %v681_v47 = vmul.f32 %v1325_v45, %v679_v46 }
 0xc14   :  { %683 = vrot.lane.b32.xlu1 %v681_v47, %s1355_s3 }
 0xc86   :  { %v684_v49 = vpop.permute.xlu1 %683 }
 0xc87   :  { %v686_v50 = vadd.f32 %v684_v49, %v676_v48 }
 0xc89   :  { %1326 = vtanh.f32 %v686_v50 }
 0xc96   :  { %v1327_v51 = vpop.eup %1326 }
 0xc97   :  { %689 = vrot.lane.b32.xlu0 %v1327_v51, %s1354_s11 }
 0xd09   :  { %v690_v52 = vpop.permute.xlu0 %689 }
 0xd0a   :  { %v692_v53 = vmul.f32 %v1325_v45, %v690_v52  ;;  %v999_v45 = vld [vmem:[%s1621_s4] sm:$0xff] }
 0xd0c   :  { %696 = vrot.lane.b32.xlu1 %v692_v53, %s1355_s3 }
 0xd7e   :  { %v697_v54 = vpop.permute.xlu1 %696 }
 0xd7f   :  { %1249 = vmatmul.mubr.msk.f32.vlgmr.msra.gmra.mxu1 %vm186_vm3, %v697_v54 }
 0xd80   :  { %1263 = vmatpush3.msra.mxu1 %v1398_v2  ;;  %1270 = vmatprep.mubr.msk.f32.mxu1 %vm1353_vm2, %v1352_v0 }
 0xd81   :  { %1264 = vmatprep.subr.mxu1 %v1352_v0 }
 0xd82   :  { %1265 = vmatpush3.msra.mxu1 %v1412_v5 }
 0xd83   :  { %1266 = vmatprep.subr.mxu1 %v1352_v0 }
 0xd84   :  { %1267 = vmatpush3.msra.mxu1 %v1420_v6 }
 0xd85   :  { %1268 = vmatprep.subr.mxu1 %v1352_v0 }
 0xd86   :  { %1269 = vmatpush3.msra.mxu1 %v1428_v7 }
 0xe3f   :  { %v766_v59 = vpop.f32.mrf.mxu1 }
 0xe40   :  { %v770_v2 = vadd.f32 %v766_v59, %v160_v56 }
 0xe41   :  { %v1250_v60 = vpop.f32.mrf.mxu1 }
 0xe42   :  { %1328 = vtanh.f32 %v770_v2  ;;  %v1110_v62 = vmul.f32 -1.442695, %v770_v2 }
 0xe44   :  { %1330 = vpow2.f32 %v1110_v62 }
 0xe4f   :  { %v1329_v61 = vpop.eup %1328 }
 0xe50   :  { %780 = vrot.lane.b32.xlu0 %v1329_v61, %s1354_s11 }
 0xe51   :  { %v1331_v5 = vpop.eup %1330 }
 0xe52   :  { %v774_v63 = vadd.f32 1.0, %v1331_v5 }
 0xe54   :  { %1332 = vrcp.f32 %v774_v63 }
 0xe61   :  { %v1333_v6 = vpop.eup %1332 }
 0xe62   :  { %v778_v7 = vmul.f32 %v1333_v6, %v686_v50  ;;  %v1115_v50 = vld [vmem:[%s1622_s5] ss:$0 sm:$0xff] }
 0xec2   :  { %v781_v1 = vpop.permute.xlu0 %780 }
 0xec3   :  { %v783_v3 = vmul.f32 %v1333_v6, %v781_v1 }
 0xec5   :  { %785 = vrot.lane.b32.xlu1 %v783_v3, %s1355_s3 }
 0xf37   :  { %v786_v4 = vpop.permute.xlu1 %785 }
 0xf38   :  { %v788_v55 = vadd.f32 %v786_v4, %v778_v7 }
 0xf3a   :  { %1334 = vtanh.f32 %v788_v55 }
 0xf47   :  { %v1335_v8 = vpop.eup %1334 }
 0xf48   :  { %791 = vrot.lane.b32.xlu0 %v1335_v8, %s1354_s11 }
 0xfba   :  { %v792_v10 = vpop.permute.xlu0 %791 }
 0xfbb   :  { %v794_v11 = vmul.f32 %v1333_v6, %v792_v10 }
 0xfbd   :  { %798 = vrot.lane.b32.xlu1 %v794_v11, %s1355_s3 }
0x102f   :  { %v799_v12 = vpop.permute.xlu1 %798 }
0x1030   :  { %1260 = vmatmul.mubr.msk.f32.vlgmr.msra.gmra.mxu0 %vm186_vm3, %v799_v12 }
0x1031   :  { %1281 = vmatprep.mubr.msk.f32.mxu0 %vm1353_vm2, %v1352_v0  ;;  %1274 = vmatpush3.msra.mxu0 %v1002_v57 }
0x1032   :  { %1275 = vmatprep.subr.mxu0 %v1352_v0 }
0x1033   :  { %1276 = vmatpush3.msra.mxu0 %v1001_v43 }
0x1034   :  { %1277 = vmatprep.subr.mxu0 %v1352_v0 }
0x1035   :  { %1278 = vmatpush3.msra.mxu0 %v1000_v44 }
0x1036   :  { %1279 = vmatprep.subr.mxu0 %v1352_v0 }
0x1037   :  { %1280 = vmatpush3.msra.mxu0 %v999_v45 }
0x10f0   :  { %v868_v14 = vpop.f32.mrf.mxu0 }
0x10f1   :  { %v872_v15 = vadd.f32 %v868_v14, %v165_v13 }
0x10f2   :  { %v1261_v16 = vpop.f32.mrf.mxu0 }
0x10f3   :  { %1336 = vtanh.f32 %v872_v15  ;;  %v1112_v18 = vmul.f32 -1.442695, %v872_v15 }
0x10f5   :  { %1338 = vpow2.f32 %v1112_v18 }
0x1100   :  { %v1337_v17 = vpop.eup %1336 }
0x1101   :  { %882 = vrot.lane.b32.xlu0 %v1337_v17, %s1354_s11 }
0x1102   :  { %v1339_v19 = vpop.eup %1338 }
0x1103   :  { %v876_v20 = vadd.f32 1.0, %v1339_v19 }
0x1105   :  { %1340 = vrcp.f32 %v876_v20 }
0x1112   :  { %v1341_v21 = vpop.eup %1340 }
0x1113   :  { %v880_v24 = vmul.f32 %v1341_v21, %v788_v55 }
0x1173   :  { %v883_v22 = vpop.permute.xlu0 %882 }
0x1174   :  { %v885_v23 = vmul.f32 %v1341_v21, %v883_v22 }
0x1176   :  { %887 = vrot.lane.b32.xlu1 %v885_v23, %s1355_s3 }
0x11e8   :  { %v888_v25 = vpop.permute.xlu1 %887 }
0x11e9   :  { %v890_v58 = vadd.f32 %v888_v25, %v880_v24 }
0x11eb   :  { %1342 = vtanh.f32 %v890_v58 }
0x11f8   :  { %v1343_v26 = vpop.eup %1342 }
0x11f9   :  { %893 = vrot.lane.b32.xlu0 %v1343_v26, %s1354_s11 }
0x126b   :  { %v894_v27 = vpop.permute.xlu0 %893 }
0x126c   :  { %v896_v28 = vmul.f32 %v1341_v21, %v894_v27 }
0x126e   :  { %900 = vrot.lane.b32.xlu1 %v896_v28, %s1355_s3 }
0x12e0   :  { %v901_v29 = vpop.permute.xlu1 %900 }
0x12e1   :  { %1271 = vmatmul.mubr.msk.f32.vlgmr.msra.gmra.mxu1 %vm186_vm3, %v901_v29 }
0x13a1   :  { %v970_v31 = vpop.f32.mrf.mxu1 }
0x13a2   :  { %v974_v32 = vadd.f32 %v970_v31, %v170_v30 }
0x13a3   :  { %v1272_v33 = vpop.f32.mrf.mxu1 }
0x13a4   :  { %1344 = vtanh.f32 %v974_v32  ;;  %v1114_v35 = vmul.f32 -1.442695, %v974_v32 }
0x13a6   :  { %1346 = vpow2.f32 %v1114_v35 }
0x13b1   :  { %v1345_v34 = vpop.eup %1344 }
0x13b2   :  { %984 = vrot.lane.b32.xlu0 %v1345_v34, %s1354_s11 }
0x13b3   :  { %v1347_v36 = vpop.eup %1346 }
0x13b4   :  { %v978_v37 = vadd.f32 1.0, %v1347_v36 }
0x13b6   :  { %1348 = vrcp.f32 %v978_v37 }
0x13c3   :  { %v1349_v38 = vpop.eup %1348 }
0x13c4   :  { %v982_v41 = vmul.f32 %v1349_v38, %v890_v58 }
0x1424   :  { %v985_v39 = vpop.permute.xlu0 %984 }
0x1425   :  { %v987_v40 = vmul.f32 %v1349_v38, %v985_v39 }
0x1427   :  { %989 = vrot.lane.b32.xlu1 %v987_v40, %s1355_s3 }
0x1499   :  { %v990_v42 = vpop.permute.xlu1 %989 }
0x149a   :  { %v992_v9 = vadd.f32 %v990_v42, %v982_v41 }
0x149c   :  { %1350 = vtanh.f32 %v992_v9 }
0x14a9   :  { %v1351_v46 = vpop.eup %1350 }
0x14aa   :  { %995 = vrot.lane.b32.xlu0 %v1351_v46, %s1354_s11 }
0x151c   :  { %v996_v47 = vpop.permute.xlu0 %995 }
0x151d   :  { %v998_v48 = vmul.f32 %v1349_v38, %v996_v47 }
0x151f   :  { %1011 = vrot.lane.b32.xlu1 %v998_v48, %s1355_s3 }
0x1591   :  { %v1012_v49 = vpop.permute.xlu1 %1011 }
0x1592   :  { %1282 = vmatmul.mubr.msk.f32.vlgmr.msra.gmra.mxu0 %vm186_vm3, %v1012_v49 }
0x1652   :  { %v1081_v51 = vpop.f32.mrf.mxu0 }
0x1653   :  { %v1082_v52 = vadd.f32 %v1115_v50, %v1081_v51 }
0x1654   :  { %v1283_v53 = vpop.f32.mrf.mxu0 }
0x1655   :  { %1085 = vst.msk [vmem:[%s1623_s6] sm:$0xff] %vm39_vm1, %v1082_v52 }

</bundles_post_ra>
